<compile_context>
chip_gen: v7x
topology: tpu7x:2x2x1
jax: 0.10.0
libtpu: 0.0.40
codegen_flags: <defaults>
</compile_context>

<pallas_src>
import functools

import jax
import jax.numpy as jnp
from jax.experimental import pallas as pl
from jax.experimental.pallas import tpu as pltpu


def _round_up(a, b):
    return ((a + b - 1) // b) * b


def _som_forward_kernel(sigma_ref, x_ref, w_ref, w2_ref, loct_ref,
                        som_ref, *packed_refs,
                        num_nodes, out_w, eps, fold_scalars):
    neg_inv_sigma_sq = sigma_ref[0, 0]          # -1 / sigma^2 (scalar, SMEM)

    x = x_ref[...]                              # (TN, D)  f32
    w = w_ref[...]                              # (D, Mp)  f32 or bf16 (pre-cast)
    w2 = w2_ref[...]                            # (1, Mp)  f32; +inf on padded lanes
    loc = loct_ref[...]                         # (2, Mp)  f32

    tn = x.shape[0]
    mp = w.shape[1]

    # torch.nn.PairwiseDistance(p=2): ||(x - w) + eps||_2 reduced over D.
    # (x - w + eps) == ((x + eps) - w); expand the squared norm so the
    # D-reduction runs on the MXU (f32 accumulation).  ||w||^2 is precomputed
    # in the wrapper (tile-invariant) with +inf in lane-padding columns, so
    # padded lanes get dists == +inf: they can never win the BMU argmin and
    # the fused exp() below maps them to exactly 0 (no NaNs: cross there is 0).
    y = x + eps
    y2 = jnp.sum(y * y, axis=1, keepdims=True)                       # (TN, 1)
    cross = jnp.dot(y.astype(w.dtype), w,
                    preferred_element_type=jnp.float32)              # (TN, Mp)
    d2 = jnp.maximum(y2 + w2 - 2.0 * cross, 0.0)
    dists = jnp.sqrt(d2)                                             # (TN, Mp)

    # losses = min over nodes; bmu = first index attaining the min (torch.min).
    col = jax.lax.broadcasted_iota(jnp.int32, (tn, mp), 1)
    losses = jnp.min(dists, axis=1, keepdims=True)                   # (TN, 1)
    bmu_idx = jnp.min(jnp.where(dists == losses, col, mp),
                      axis=1, keepdims=True)                         # (TN, 1) i32

    # Arithmetic decode of the BMU map coordinates (locations are row-major:
    # idx = x * out_w + y).  The +0.5 keeps floor() robust to division rounding.
    idx_f = bmu_idx.astype(jnp.float32)
    bmu_x = jnp.floor((idx_f + 0.5) / out_w)                         # (TN, 1)
    bmu_y = idx_f - bmu_x * out_w                                    # (TN, 1)

    # Fused tail: exp(-(d_map^2 / sigma^2)) * exp(losses - dists)
    #           = exp((losses - dists) + d_map^2 * (-1/sigma^2))
    loc_x = loc[0:1, :]                                              # (1, Mp)
    loc_y = loc[1:2, :]                                              # (1, Mp)
    dist_sq_loc = (loc_x - bmu_x) ** 2 + (loc_y - bmu_y) ** 2        # (TN, Mp)
    som = jnp.exp((losses - dists) + dist_sq_loc * neg_inv_sigma_sq)

    if fold_scalars:
        # Stash the per-sample scalars in (otherwise-zero) lane-padding columns:
        # one fully lane-dense store per tile instead of a second masked store.
        som = jnp.where(col == num_nodes, bmu_x, som)
        som = jnp.where(col == num_nodes + 1, bmu_y, som)
        som = jnp.where(col == num_nodes + 2, losses, som)
        som_ref[...] = som
    else:
        som_ref[...] = som
        col8 = jax.lax.broadcasted_iota(jnp.int32, (tn, 8), 1)
        packed_refs[0][...] = jnp.where(
            col8 == 0, bmu_x,
            jnp.where(col8 == 1, bmu_y,
                      jnp.where(col8 == 2, losses, 0.0)))


@functools.partial(jax.jit,
                   static_argnames=("num_nodes", "out_w", "tile_n", "eps", "trim"))
def _som_forward(x, weight_p, w2_p, loc_t_p, sigma,
                 *, num_nodes, out_w, tile_n, eps, trim=True):
    n = x.shape[0]
    d = weight_p.shape[0]
    m_pad = weight_p.shape[1]

    xf = x.reshape(n, -1).astype(jnp.float32)                        # (N, D)

    # ---- batch-tile selection ---------------------------------------------
    # Keep the double-buffered streamed tiles (x in, som out) under ~24 MiB so
    # the kernel fits comfortably in v7x's 64 MiB per-TC VMEM, and cap the tile
    # so the grid has >= 2 steps (lets the "parallel" axis split across the two
    # TensorCores of a v7x megacore).  v5e/v6e can pass a larger tile_n.
    bytes_per_row = 4 * (d + m_pad)
    tn_vmem_cap = max(8, ((24 << 20) // (2 * bytes_per_row)) // 8 * 8)
    tn_split_cap = max(8, _round_up((n + 1) // 2, 8))
    tn = max(8, min(int(tile_n), _round_up(n, 8), tn_vmem_cap, tn_split_cap))
    n_pad = _round_up(n, tn)
    if n_pad != n:
        xf = jnp.pad(xf, ((0, n_pad - n), (0, 0)))

    # ---- explicit VMEM limit (scoped default is only 16/32 MiB) ------------
    est = (2 * d * m_pad * weight_p.dtype.itemsize       # resident weight (dbl-buffered)
           + 2 * tn * (d + m_pad) * 4                    # streamed x / som tiles
           + 2 * 3 * m_pad * 4                           # ||w||^2 + locations
           + 8 * tn * m_pad * 4                          # (TN, Mp) intermediates
           + (4 << 20))                                  # headroom
    vmem_limit = int(min(max(est, 32 << 20), 48 << 20))

    # -1/sigma^2 as an SMEM scalar: annealing sigma never triggers recompiles.
    neg_inv_sigma_sq = (-1.0 / (sigma * sigma)).astype(jnp.float32).reshape(1, 1)

    fold_scalars = (m_pad - num_nodes) >= 3
    kernel = functools.partial(_som_forward_kernel,
                               num_nodes=num_nodes, out_w=out_w, eps=eps,
                               fold_scalars=fold_scalars)

    out_shape = [jax.ShapeDtypeStruct((n_pad, m_pad), jnp.float32)]
    out_specs = [pl.BlockSpec((tn, m_pad), lambda i: (i, 0))]
    if not fold_scalars:
        out_shape.append(jax.ShapeDtypeStruct((n_pad, 8), jnp.float32))
        out_specs.append(pl.BlockSpec((tn, 8), lambda i: (i, 0)))

    results = pl.pallas_call(
        kernel,
        out_shape=tuple(out_shape),
        grid=(n_pad // tn,),
        in_specs=[
            pl.BlockSpec(memory_space=pltpu.MemorySpace.SMEM),   # -1/sigma^2 scalar
            pl.BlockSpec((tn, d), lambda i: (i, 0)),             # x tile (streamed)
            pl.BlockSpec((d, m_pad), lambda i: (0, 0)),          # weight (VMEM-resident)
            pl.BlockSpec((1, m_pad), lambda i: (0, 0)),          # ||w||^2 (+inf pad lanes)
            pl.BlockSpec((2, m_pad), lambda i: (0, 0)),          # locations^T (resident)
        ],
        out_specs=tuple(out_specs),
        compiler_params=pltpu.CompilerParams(
            dimension_semantics=("parallel",),
            vmem_limit_bytes=vmem_limit),
    )(neg_inv_sigma_sq, xf, weight_p, w2_p, loc_t_p)

    if fold_scalars:
        som_p, = results
        bmu_x = som_p[:n, num_nodes]
        bmu_y = som_p[:n, num_nodes + 1]
        losses = som_p[:n, num_nodes + 2]
    else:
        som_p, packed = results
        bmu_x = packed[:n, 0]
        bmu_y = packed[:n, 1]
        losses = packed[:n, 2]

    bmu_locations = jnp.stack([bmu_x, bmu_y], axis=-1).reshape(n, 1, 2)
    loss = jnp.sum(losses) / n            # device scalar (no host sync here)
    # Trimming to (N, num_nodes) costs an extra HBM copy of the whole buffer;
    # pass trim=False to consume the lane-padded (N, m_pad) output directly.
    som_output = som_p[:n, :num_nodes] if trim else som_p
    return bmu_locations, loss, som_output


class SOMPallas:
    """JAX/Pallas port of the PyTorch SOM module's forward pass."""

    def __init__(self, input_size, out_size=(10, 10), sigma=None, key=None,
                 tile_n=512, use_bf16_matmul=False):
        self.input_size = int(input_size)
        self.out_size = tuple(out_size)
        self.sigma = (max(out_size) / 2) if sigma is None else float(sigma)
        self.num_nodes = out_size[0] * out_size[1]
        self.m_pad = _round_up(self.num_nodes, 128)   # lane-dense node axis
        self.tile_n = int(tile_n)                     # v7x-safe default; raise on v5e/v6e
        # bf16 matmul inputs suffer cancellation in the norm-expansion distance
        # and can flip near-tied BMUs -> default off; enable for extra speed.
        self.use_bf16_matmul = bool(use_bf16_matmul)
        self.eps = 1e-6                               # nn.PairwiseDistance default

        if key is None:
            key = jax.random.PRNGKey(0)
        # Deterministic synthetic init (matches torch.randn(input_size, M) shape).
        self.weight = jax.random.normal(
            key, (self.input_size, self.num_nodes), jnp.float32)
        # Map locations: all (x, y) pairs of the output grid, shape (M, 2).
        locs = [(xx, yy) for xx in range(out_size[0]) for yy in range(out_size[1])]
        self.locations = jnp.asarray(locs, dtype=jnp.float32)

        pad = self.m_pad - self.num_nodes
        weight_padded = jnp.pad(self.weight, ((0, 0), (0, pad)))
        # Hoisted ||w||^2 (exact, f32): +inf in lane-padding columns so those
        # lanes can never be the BMU (their cross term is exactly 0 -> no NaN).
        w2 = jnp.sum(weight_padded * weight_padded, axis=0, keepdims=True)
        lane = jnp.arange(self.m_pad)[None, :]
        self.w2_padded = jnp.where(lane < self.num_nodes, w2,
                                   jnp.inf).astype(jnp.float32)
        # Kernel-side weight: pre-cast once to bf16 if requested (halves its
        # DMA bytes and VMEM residency); the f32 copy above keeps w2 exact.
        self.weight_padded = (weight_padded.astype(jnp.bfloat16)
                              if self.use_bf16_matmul else weight_padded)
        self.loc_t_padded = jnp.pad(self.locations.T, ((0, 0), (0, pad)))

    def forward(self, x, sigma=None):
        s = jnp.float32(self.sigma if sigma is None else sigma)
        # Returns (bmu_locations (N,1,2), loss (device scalar), som_output (N,M)).
        # Call float(loss) if the torch-style host Python float is really wanted.
        return _som_forward(x, self.weight_padded, self.w2_padded,
                            self.loc_t_padded, s,
                            num_nodes=self.num_nodes, out_w=self.out_size[1],
                            tile_n=self.tile_n, eps=self.eps)


if __name__ == "__main__":
    key = jax.random.PRNGKey(0)
    k_w, k_x = jax.random.split(key)

    # Small example: x of shape (2, 4, 16, 16) -> per-sample feature dim 1024.
    batch, c, h, w = 2, 4, 16, 16
    input_size = c * h * w
    out_size = (10, 10)

    som = SOMPallas(input_size, out_size=out_size, key=k_w)
    x = jax.random.normal(k_x, (batch, c, h, w), jnp.float32)

    bmu_locations, loss, som_output = som.forward(x)
    jax.block_until_ready((bmu_locations, loss, som_output))

    assert bmu_locations.shape == (batch, 1, 2)
    assert som_output.shape == (batch, out_size[0] * out_size[1])
    assert bool(jnp.isfinite(loss))
    assert bool(jnp.all(jnp.isfinite(som_output)))

    # Pure-JAX reference of the torch forward (direct (x - w)^2 distance).
    def reference_forward(xr, weight, locations, sigma, eps=1e-6):
        nr = xr.shape[0]
        xf = xr.reshape(nr, -1).astype(jnp.float32)
        diff = xf[:, :, None] - weight[None, :, :] + eps          # (N, D, M)
        dists = jnp.sqrt(jnp.sum(diff * diff, axis=1))            # (N, M)
        losses = jnp.min(dists, axis=1, keepdims=True)
        bmu_idx = jnp.argmin(dists, axis=1)
        bmu_loc = locations[bmu_idx].reshape(nr, 1, 2)
        d2 = jnp.sum((locations[None, :, :] - bmu_loc) ** 2, axis=2)
        lr_loc = jnp.exp(-(d2 / (sigma ** 2)))
        return bmu_loc, jnp.sum(losses) / nr, jnp.exp(-dists + losses) * lr_loc

    ref_bmu, ref_loss, ref_som = reference_forward(
        x, som.weight, som.locations, som.sigma)
    assert bool(jnp.all(bmu_locations == ref_bmu))
    assert bool(jnp.allclose(loss, ref_loss, rtol=1e-4, atol=1e-4))
    assert bool(jnp.allclose(som_output, ref_som, rtol=2e-3, atol=2e-3))

    print("KERNEL_OK")
</pallas_src>

<mosaic_0001>
module attributes {stable_mosaic.version = 11 : i64} {
  func.func @_som_forward_kernel(%arg0: i32, %arg1: memref<1x1xf32, #tpu.memory_space<smem>>, %arg2: memref<8x1024xf32, #tpu.memory_space<vmem>>, %arg3: memref<1024x128xf32, #tpu.memory_space<vmem>>, %arg4: memref<1x128xf32, #tpu.memory_space<vmem>>, %arg5: memref<2x128xf32, #tpu.memory_space<vmem>>, %arg6: memref<8x128xf32, #tpu.memory_space<vmem>>) attributes {dimension_semantics = [#tpu.dimension_semantics<parallel>], iteration_bounds = array<i64: 1>, scalar_prefetch = 0 : i64, scratch_operands = 0 : i64, tpu.core_type = #tpu.core_type<tc>, window_params = [{transform_indices = @transform_0, window_bounds = array<i64: 1, 1>}, {transform_indices = @transform_1, window_bounds = array<i64: 8, 1024>}, {pipeline_mode = #tpu.pipeline_mode<synchronous>, transform_indices = @transform_2, window_bounds = array<i64: 1024, 128>}, {pipeline_mode = #tpu.pipeline_mode<synchronous>, transform_indices = @transform_3, window_bounds = array<i64: 1, 128>}, {pipeline_mode = #tpu.pipeline_mode<synchronous>, transform_indices = @transform_4, window_bounds = array<i64: 2, 128>}, {transform_indices = @transform_5, window_bounds = array<i64: 8, 128>}]} {
    %c0 = arith.constant 0 : index
    %c0_0 = arith.constant 0 : index
    %0 = memref.load %arg1[%c0, %c0_0] : memref<1x1xf32, #tpu.memory_space<smem>>
    %c0_1 = arith.constant 0 : index
    %c0_2 = arith.constant 0 : index
    %1 = vector.load %arg2[%c0_1, %c0_2] : memref<8x1024xf32, #tpu.memory_space<vmem>>, vector<8x1024xf32>
    %c0_3 = arith.constant 0 : index
    %c0_4 = arith.constant 0 : index
    %2 = vector.load %arg3[%c0_3, %c0_4] : memref<1024x128xf32, #tpu.memory_space<vmem>>, vector<1024x128xf32>
    %c0_5 = arith.constant 0 : index
    %c0_6 = arith.constant 0 : index
    %3 = vector.load %arg4[%c0_5, %c0_6] : memref<1x128xf32, #tpu.memory_space<vmem>>, vector<1x128xf32>
    %c0_7 = arith.constant 0 : index
    %c0_8 = arith.constant 0 : index
    %4 = vector.load %arg5[%c0_7, %c0_8] : memref<2x128xf32, #tpu.memory_space<vmem>>, vector<2x128xf32>
    %cst = arith.constant 9.99999997E-7 : f32
    %5 = vector.broadcast %cst : f32 to vector<8x1024xf32>
    %6 = arith.addf %1, %5 : vector<8x1024xf32>
    %7 = arith.mulf %6, %6 : vector<8x1024xf32>
    %cst_9 = arith.constant dense<0.000000e+00> : vector<8xf32>
    %8 = vector.multi_reduction <add>, %7, %cst_9 [1] : vector<8x1024xf32> to vector<8xf32>
    %9 = vector.shape_cast %8 : vector<8xf32> to vector<8x1xf32>
    %cst_10 = arith.constant dense<0.000000e+00> : vector<8x128xf32>
    %10 = tpu.matmul %6, %2, %cst_10 {dimension_numbers = #tpu.dot_dimension_numbers<[1], [0], [0], [1], [0, 0, 1, 1], [], []>} : vector<8x1024xf32>, vector<1024x128xf32>, vector<8x128xf32> -> vector<8x128xf32>
    %11 = vector.broadcast %9 : vector<8x1xf32> to vector<8x128xf32>
    %12 = vector.broadcast %3 : vector<1x128xf32> to vector<8x128xf32>
    %13 = arith.addf %11, %12 : vector<8x128xf32>
    %cst_11 = arith.constant 2.000000e+00 : f32
    %14 = vector.broadcast %cst_11 : f32 to vector<8x128xf32>
    %15 = arith.mulf %14, %10 : vector<8x128xf32>
    %16 = arith.subf %13, %15 : vector<8x128xf32>
    %cst_12 = arith.constant 0.000000e+00 : f32
    %17 = vector.broadcast %cst_12 : f32 to vector<8x128xf32>
    %18 = arith.maximumf %16, %17 : vector<8x128xf32>
    %19 = math.sqrt %18 : vector<8x128xf32>
    %20 = tpu.iota {dimensions = array<i32: 1>} : vector<8x128xi32>
    %cst_13 = arith.constant dense<0x7F800000> : vector<8xf32>
    %21 = vector.multi_reduction <minimumf>, %19, %cst_13 [1] : vector<8x128xf32> to vector<8xf32>
    %22 = vector.shape_cast %21 : vector<8xf32> to vector<8x1xf32>
    %23 = vector.broadcast %22 : vector<8x1xf32> to vector<8x128xf32>
    %24 = arith.cmpf oeq, %19, %23 : vector<8x128xf32>
    %c128_i32 = arith.constant 128 : i32
    %25 = vector.broadcast %c128_i32 : i32 to vector<8x128xi32>
    %26 = arith.select %24, %20, %25 : vector<8x128xi1>, vector<8x128xi32>
    %cst_14 = arith.constant dense<2147483647> : vector<8xi32>
    %27 = vector.multi_reduction <minsi>, %26, %cst_14 [1] : vector<8x128xi32> to vector<8xi32>
    %28 = vector.shape_cast %27 : vector<8xi32> to vector<8x1xi32>
    %29 = arith.sitofp %28 : vector<8x1xi32> to vector<8x1xf32>
    %cst_15 = arith.constant 5.000000e-01 : f32
    %30 = vector.broadcast %cst_15 : f32 to vector<8x1xf32>
    %31 = arith.addf %29, %30 : vector<8x1xf32>
    %cst_16 = arith.constant 1.000000e+01 : f32
    %32 = vector.broadcast %cst_16 : f32 to vector<8x1xf32>
    %33 = arith.divf %31, %32 : vector<8x1xf32>
    %34 = math.floor %33 : vector<8x1xf32>
    %cst_17 = arith.constant 1.000000e+01 : f32
    %35 = vector.broadcast %cst_17 : f32 to vector<8x1xf32>
    %36 = arith.mulf %34, %35 : vector<8x1xf32>
    %37 = arith.subf %29, %36 : vector<8x1xf32>
    %38 = vector.extract_strided_slice %4 {offsets = [0, 0], sizes = [1, 128], strides = [1, 1]} : vector<2x128xf32> to vector<1x128xf32>
    %39 = vector.extract_strided_slice %4 {offsets = [1, 0], sizes = [1, 128], strides = [1, 1]} : vector<2x128xf32> to vector<1x128xf32>
    %40 = vector.broadcast %38 : vector<1x128xf32> to vector<8x128xf32>
    %41 = vector.broadcast %34 : vector<8x1xf32> to vector<8x128xf32>
    %42 = arith.subf %40, %41 : vector<8x128xf32>
    %43 = arith.mulf %42, %42 : vector<8x128xf32>
    %44 = vector.broadcast %39 : vector<1x128xf32> to vector<8x128xf32>
    %45 = vector.broadcast %37 : vector<8x1xf32> to vector<8x128xf32>
    %46 = arith.subf %44, %45 : vector<8x128xf32>
    %47 = arith.mulf %46, %46 : vector<8x128xf32>
    %48 = arith.addf %43, %47 : vector<8x128xf32>
    %49 = vector.broadcast %22 : vector<8x1xf32> to vector<8x128xf32>
    %50 = arith.subf %49, %19 : vector<8x128xf32>
    %51 = vector.broadcast %0 : f32 to vector<8x128xf32>
    %52 = arith.mulf %48, %51 : vector<8x128xf32>
    %53 = arith.addf %50, %52 : vector<8x128xf32>
    %54 = math.exp %53 : vector<8x128xf32>
    %c100_i32 = arith.constant 100 : i32
    %55 = vector.broadcast %c100_i32 : i32 to vector<8x128xi32>
    %56 = arith.cmpi eq, %20, %55 : vector<8x128xi32>
    %57 = vector.shape_cast %34 : vector<8x1xf32> to vector<8x1xf32>
    %58 = vector.broadcast %57 : vector<8x1xf32> to vector<8x128xf32>
    %59 = arith.select %56, %58, %54 : vector<8x128xi1>, vector<8x128xf32>
    %c101_i32 = arith.constant 101 : i32
    %60 = vector.broadcast %c101_i32 : i32 to vector<8x128xi32>
    %61 = arith.cmpi eq, %20, %60 : vector<8x128xi32>
    %62 = vector.shape_cast %37 : vector<8x1xf32> to vector<8x1xf32>
    %63 = vector.broadcast %62 : vector<8x1xf32> to vector<8x128xf32>
    %64 = arith.select %61, %63, %59 : vector<8x128xi1>, vector<8x128xf32>
    %c102_i32 = arith.constant 102 : i32
    %65 = vector.broadcast %c102_i32 : i32 to vector<8x128xi32>
    %66 = arith.cmpi eq, %20, %65 : vector<8x128xi32>
    %67 = vector.shape_cast %22 : vector<8x1xf32> to vector<8x1xf32>
    %68 = vector.broadcast %67 : vector<8x1xf32> to vector<8x128xf32>
    %69 = arith.select %66, %68, %64 : vector<8x128xi1>, vector<8x128xf32>
    %c0_18 = arith.constant 0 : index
    %c0_19 = arith.constant 0 : index
    %70 = vector.load %arg6[%c0_18, %c0_19] : memref<8x128xf32, #tpu.memory_space<vmem>>, vector<8x128xf32>
    tpu.vector_store %arg6[%c0_18, %c0_19], %69 {strides = array<i32>} : memref<8x128xf32, #tpu.memory_space<vmem>>, vector<8x128xf32>,
    return
  }
  func.func @transform_0(%arg0: i32) -> (i32, i32) {
    %c0_i32 = arith.constant 0 : i32
    %c0_i32_0 = arith.constant 0 : i32
    %c0_i32_1 = arith.constant 0 : i32
    return %c0_i32, %c0_i32_0 : i32, i32
  }
  func.func @transform_1(%arg0: i32) -> (i32, i32) {
    %c0_i32 = arith.constant 0 : i32
    %c0_i32_0 = arith.constant 0 : i32
    return %arg0, %c0_i32 : i32, i32
  }
  func.func @transform_2(%arg0: i32) -> (i32, i32) {
    %c0_i32 = arith.constant 0 : i32
    %c0_i32_0 = arith.constant 0 : i32
    %c0_i32_1 = arith.constant 0 : i32
    return %c0_i32, %c0_i32_0 : i32, i32
  }
  func.func @transform_3(%arg0: i32) -> (i32, i32) {
    %c0_i32 = arith.constant 0 : i32
    %c0_i32_0 = arith.constant 0 : i32
    %c0_i32_1 = arith.constant 0 : i32
    return %c0_i32, %c0_i32_0 : i32, i32
  }
  func.func @transform_4(%arg0: i32) -> (i32, i32) {
    %c0_i32 = arith.constant 0 : i32
    %c0_i32_0 = arith.constant 0 : i32
    %c0_i32_1 = arith.constant 0 : i32
    return %c0_i32, %c0_i32_0 : i32, i32
  }
  func.func @transform_5(%arg0: i32) -> (i32, i32) {
    %c0_i32 = arith.constant 0 : i32
    %c0_i32_0 = arith.constant 0 : i32
    return %arg0, %c0_i32 : i32, i32
  }
}

</mosaic_0001>

<bundles_post_ra>
// kernel: _som_forward.1
= control target key start
LH: loop header
LB: loop body
LE: loop exit
PB: predicated region body
PF: predicated region fallthrough
CT: control target
= control target key end

     0   :  { %11 = vsyncpa [#allocation4], 0  ;;  %s854_s18 = smov [#allocation3]   ;;  %s945_s0 = inlined_call_operand.<no memory space> [shape: f32[1,1], index: 0, kind: input, shape index: {}]   ;;  %s946_s1 = inlined_call_operand.vmem [shape: f32[8,1024], index: 1, kind: input, shape index: {}]   ;;  %s947_s2 = inlined_call_operand.hbm [shape: f32[1024,128], index: 2, kind: input, shape index: {}]   ;;  %s948_s3 = inlined_call_operand.vmem [shape: f32[1,128], index: 3, kind: input, shape index: {}]   ;;  %s949_s4 = inlined_call_operand.vmem [shape: f32[2,128], index: 4, kind: input, shape index: {}]   ;;  %s950_s5 = inlined_call_operand.vmem [shape: f32[8,128], index: 5, kind: output, shape index: {}]  }
   0x1   :  { %s21_s19 = sshll.u32 %s854_s18, 4  ;;  %s830_s22 = scalar_lea.hbm %s947_s2, 16384  ;;  %s22_s19 = int_to_ptr.vmem [resolvable:$true] %s21_s19 }
   0x2   :  { %p831_p0 = scmp.ne.s32.totalorder %s947_s2, %s830_s22  ;;  %p834_p1 = scmp.lt.u32.totalorder %s830_s22, %s947_s2 }
   0x4   :  { %p836_p2 = pnand %p834_p1, %p831_p0 }
   0x6   :  { %839 = shalt.err (!%p836_p2)
}
   0x7   :  { %s840_s27 = scalar_lea.vmem %s22_s19, 16384  ;;  %p845_p4 = scmp.lt.s32.totalorder %s22_s19, %s22_s19 }
   0x8   :  { %p841_p3 = scmp.ne.s32.totalorder %s22_s19, %s840_s27  ;;  %p846_p5 = scmp.lt.s32.totalorder %s840_s27, %s840_s27 }
   0xa   :  { %p847_p6 = por %p846_p5, %p845_p4 }
   0xc   :  { %p848_p7 = pnand %p847_p6, %p841_p3 }
   0xe   :  { %851 = shalt.err (!%p848_p7)
}
   0xf   :  { %s855_s28 = smov 128   ;;  %s856_s29 = smov 8  }
  0x10   :  { %27 = dma.hbm_to_vmem [thread:$0]  %s947_s2, 16384, %s22_s19, [#allocation4], %s855_s28, %s855_s28, %s856_s29  }
  0x11   :  { %852 = dma.done.wait [#allocation4], 16384  }
  0x12   :  { %853 = vsyncadd [#allocation4], 4294950912  ;;  %v60_v0 = vld [vmem:[#allocation3 + $0x80] sm:$0xff]  ;;  %v61_v1 = vld [vmem:[#allocation3 + $0x88] sm:$0xff] }
  0x13   :  { %v92_v2 = vld [vmem:[#allocation3 + $0x180] sm:$0xff]  ;;  %v695_v3 = vpack.c.bf16 %v61_v1, %v60_v0  ;;  %v93_v4 = vld [vmem:[#allocation3 + $0x188] sm:$0xff]  ;;  %v62_v11 = vld [vmem:[#allocation3 + $0x90] sm:$0xff] }
  0x14   :  { %v44_v5 = vld [vmem:[#allocation3] sm:$0xff]  ;;  %v45_v6 = vld [vmem:[#allocation3 + $0x8] sm:$0xff]  ;;  %v727_v7 = vpack.c.bf16 %v93_v4, %v92_v2  ;;  %v63_v13 = vld [vmem:[#allocation3 + $0x98] sm:$0xff] }
  0x15   :  { %v697_v8 = vpack.c.bf16 %v45_v6, %v44_v5  ;;  %v76_v9 = vld [vmem:[#allocation3 + $0x100] sm:$0xff]  ;;  %v77_v10 = vld [vmem:[#allocation3 + $0x108] sm:$0xff]  ;;  %696 = vmatprep.subr.bf16.mxu0 %v695_v3  ;;  %v94_v14 = vld [vmem:[#allocation3 + $0x190] sm:$0xff]  ;;  %v699_v16 = vpack.c.bf16 %v63_v13, %v62_v11 }
  0x16   :  { %v729_v12 = vpack.c.bf16 %v77_v10, %v76_v9  ;;  %v95_v15 = vld [vmem:[#allocation3 + $0x198] sm:$0xff]  ;;  %728 = vmatprep.subr.bf16.mxu1 %v727_v7  ;;  %v46_v18 = vld [vmem:[#allocation3 + $0x10] sm:$0xff]  ;;  %v64_v23 = vld [vmem:[#allocation3 + $0xa0] sm:$0xff] }
  0x17   :  { %698 = vmatpush3.bf16.msra.mxu0 %v697_v8  ;;  %v731_v17 = vpack.c.bf16 %v95_v15, %v94_v14  ;;  %v47_v19 = vld [vmem:[#allocation3 + $0x18] sm:$0xff]  ;;  %v78_v20 = vld [vmem:[#allocation3 + $0x110] sm:$0xff]  ;;  %v65_v24 = vld [vmem:[#allocation3 + $0xa8] sm:$0xff] }
  0x18   :  { %730 = vmatpush3.bf16.msra.mxu1 %v729_v12  ;;  %v701_v21 = vpack.c.bf16 %v47_v19, %v46_v18  ;;  %v79_v22 = vld [vmem:[#allocation3 + $0x118] sm:$0xff]  ;;  %700 = vmatprep.subr.bf16.mxu0 %v699_v16  ;;  %v703_v26 = vpack.c.bf16 %v65_v24, %v64_v23  ;;  %v96_v27 = vld [vmem:[#allocation3 + $0x1a0] sm:$0xff]  ;;  %v97_v28 = vld [vmem:[#allocation3 + $0x1a8] sm:$0xff] }
  0x19   :  { %732 = vmatprep.subr.bf16.mxu1 %v731_v17  ;;  %v733_v25 = vpack.c.bf16 %v79_v22, %v78_v20  ;;  %v48_v29 = vld [vmem:[#allocation3 + $0x20] sm:$0xff]  ;;  %v735_v30 = vpack.c.bf16 %v97_v28, %v96_v27  ;;  %v49_v31 = vld [vmem:[#allocation3 + $0x28] sm:$0xff]  ;;  %v66_v35 = vld [vmem:[#allocation3 + $0xb0] sm:$0xff] }
  0x1a   :  { %v80_v32 = vld [vmem:[#allocation3 + $0x120] sm:$0xff]  ;;  %v81_v33 = vld [vmem:[#allocation3 + $0x128] sm:$0xff]  ;;  %v705_v34 = vpack.c.bf16 %v49_v31, %v48_v29  ;;  %v67_v36 = vld [vmem:[#allocation3 + $0xb8] sm:$0xff] }
  0x1b   :  { %702 = vmatpush3.bf16.msra.mxu0 %v701_v21  ;;  %v98_v37 = vld [vmem:[#allocation3 + $0x1b0] sm:$0xff]  ;;  %v737_v38 = vpack.c.bf16 %v81_v33, %v80_v32  ;;  %v707_v39 = vpack.c.bf16 %v67_v36, %v66_v35  ;;  %v99_v40 = vld [vmem:[#allocation3 + $0x1b8] sm:$0xff]  ;;  %v68_v46 = vld [vmem:[#allocation3 + $0xc0] sm:$0xff] }
  0x1c   :  { %734 = vmatpush3.bf16.msra.mxu1 %v733_v25  ;;  %704 = vmatprep.subr.bf16.mxu0 %v703_v26  ;;  %v50_v41 = vld [vmem:[#allocation3 + $0x30] sm:$0xff]  ;;  %v51_v42 = vld [vmem:[#allocation3 + $0x38] sm:$0xff]  ;;  %v739_v43 = vpack.c.bf16 %v99_v40, %v98_v37  ;;  %v69_v47 = vld [vmem:[#allocation3 + $0xc8] sm:$0xff] }
  0x1d   :  { %736 = vmatprep.subr.bf16.mxu1 %v735_v30  ;;  %v82_v44 = vld [vmem:[#allocation3 + $0x130] sm:$0xff]  ;;  %v83_v45 = vld [vmem:[#allocation3 + $0x138] sm:$0xff]  ;;  %v100_v48 = vld [vmem:[#allocation3 + $0x1c0] sm:$0xff]  ;;  %v709_v50 = vpack.c.bf16 %v51_v42, %v50_v41  ;;  %v711_v52 = vpack.c.bf16 %v69_v47, %v68_v46 }
  0x1e   :  { %v101_v49 = vld [vmem:[#allocation3 + $0x1c8] sm:$0xff]  ;;  %v741_v51 = vpack.c.bf16 %v83_v45, %v82_v44  ;;  %v52_v53 = vld [vmem:[#allocation3 + $0x40] sm:$0xff]  ;;  %v70_v58 = vld [vmem:[#allocation3 + $0xd0] sm:$0xff] }
  0x1f   :  { %706 = vmatpush3.bf16.msra.mxu0 %v705_v34  ;;  %v53_v54 = vld [vmem:[#allocation3 + $0x48] sm:$0xff]  ;;  %v84_v55 = vld [vmem:[#allocation3 + $0x140] sm:$0xff]  ;;  %v743_v56 = vpack.c.bf16 %v101_v49, %v100_v48  ;;  %v71_v59 = vld [vmem:[#allocation3 + $0xd8] sm:$0xff] }
  0x20   :  { %738 = vmatpush3.bf16.msra.mxu1 %v737_v38  ;;  %708 = vmatprep.subr.bf16.mxu0 %v707_v39  ;;  %v85_v57 = vld [vmem:[#allocation3 + $0x148] sm:$0xff]  ;;  %v102_v60 = vld [vmem:[#allocation3 + $0x1d0] sm:$0xff]  ;;  %v103_v61 = vld [vmem:[#allocation3 + $0x1d8] sm:$0xff]  ;;  %v713_v62 = vpack.c.bf16 %v53_v54, %v52_v53  ;;  %v715_v0 = vpack.c.bf16 %v71_v59, %v70_v58 }
  0x21   :  { %740 = vmatprep.subr.bf16.mxu1 %v739_v43  ;;  %v745_v63 = vpack.c.bf16 %v85_v57, %v84_v55  ;;  %v54_v1 = vld [vmem:[#allocation3 + $0x50] sm:$0xff]  ;;  %v55_v2 = vld [vmem:[#allocation3 + $0x58] sm:$0xff]  ;;  %v747_v4 = vpack.c.bf16 %v103_v61, %v102_v60  ;;  %v72_v6 = vld [vmem:[#allocation3 + $0xe0] sm:$0xff] }
  0x22   :  { %v86_v3 = vld [vmem:[#allocation3 + $0x150] sm:$0xff]  ;;  %v87_v5 = vld [vmem:[#allocation3 + $0x158] sm:$0xff]  ;;  %v73_v7 = vld [vmem:[#allocation3 + $0xe8] sm:$0xff]  ;;  %v717_v10 = vpack.c.bf16 %v55_v2, %v54_v1 }
  0x23   :  { %710 = vmatpush3.bf16.msra.mxu0 %v709_v50  ;;  %v104_v8 = vld [vmem:[#allocation3 + $0x1e0] sm:$0xff]  ;;  %v105_v9 = vld [vmem:[#allocation3 + $0x1e8] sm:$0xff]  ;;  %v749_v14 = vpack.c.bf16 %v87_v5, %v86_v3  ;;  %v719_v15 = vpack.c.bf16 %v73_v7, %v72_v6  ;;  %v39_v18 = vld [vmem:[%s946_s1 + $0x18] sm:$0xff] }
  0x24   :  { %742 = vmatpush3.bf16.msra.mxu1 %v741_v51  ;;  %712 = vmatprep.subr.bf16.mxu0 %v711_v52  ;;  %v56_v11 = vld [vmem:[#allocation3 + $0x60] sm:$0xff]  ;;  %v57_v12 = vld [vmem:[#allocation3 + $0x68] sm:$0xff]  ;;  %v751_v19 = vpack.c.bf16 %v105_v9, %v104_v8  ;;  %v74_v20 = vld [vmem:[#allocation3 + $0xf0] sm:$0xff]  ;;  %v905_v23 = vadd.f32 1e-06, %v39_v18 }
  0x25   :  { %744 = vmatprep.subr.bf16.mxu1 %v743_v56  ;;  %v88_v13 = vld [vmem:[#allocation3 + $0x160] sm:$0xff]  ;;  %v89_v16 = vld [vmem:[#allocation3 + $0x168] sm:$0xff]  ;;  %v75_v21 = vld [vmem:[#allocation3 + $0xf8] sm:$0xff]  ;;  %v721_v26 = vpack.c.bf16 %v57_v12, %v56_v11 }
  0x26   :  { %v37_v17 = vld [vmem:[%s946_s1 + $0x8] sm:$0xff]  ;;  %v106_v24 = vld [vmem:[#allocation3 + $0x1f0] sm:$0xff]  ;;  %v107_v25 = vld [vmem:[#allocation3 + $0x1f8] sm:$0xff]  ;;  %v753_v27 = vpack.c.bf16 %v89_v16, %v88_v13  ;;  %v723_v28 = vpack.c.bf16 %v75_v21, %v74_v20  ;;  %333 = vmatprep.mubr.f32.mxu1 %v905_v23 }
  0x27   :  { %714 = vmatpush3.bf16.msra.mxu0 %v713_v62  ;;  %v175_v22 = vadd.f32 1e-06, %v37_v17  ;;  %v58_v29 = vld [vmem:[#allocation3 + $0x70] sm:$0xff]  ;;  %v59_v30 = vld [vmem:[#allocation3 + $0x78] sm:$0xff]  ;;  %v755_v32 = vpack.c.bf16 %v107_v25, %v106_v24  ;;  %v124_v34 = vld [vmem:[#allocation3 + $0x280] sm:$0xff]  ;;  %v185_v25 = vmul.f32 %v905_v23, %v905_v23 }
  0x28   :  { %746 = vmatpush3.bf16.msra.mxu1 %v745_v63  ;;  %716 = vmatprep.subr.bf16.mxu0 %v715_v0  ;;  %v90_v31 = vld [vmem:[#allocation3 + $0x170] sm:$0xff]  ;;  %v91_v33 = vld [vmem:[#allocation3 + $0x178] sm:$0xff]  ;;  %v125_v35 = vld [vmem:[#allocation3 + $0x288] sm:$0xff]  ;;  %v725_v38 = vpack.c.bf16 %v59_v30, %v58_v29 }
  0x29   :  { %748 = vmatprep.subr.bf16.mxu1 %v747_v4  ;;  %263 = vmatprep.mubr.f32.mxu0 %v175_v22  ;;  %v156_v36 = vld [vmem:[#allocation3 + $0x380] sm:$0xff]  ;;  %v157_v37 = vld [vmem:[#allocation3 + $0x388] sm:$0xff]  ;;  %v38_v40 = vld [vmem:[%s946_s1 + $0x10] sm:$0xff]  ;;  %v757_v41 = vpack.c.bf16 %v91_v33, %v90_v31  ;;  %v759_v42 = vpack.c.bf16 %v125_v35, %v124_v34  ;;  %v183_v60 = vmul.f32 %v175_v22, %v175_v22 }
  0x2a   :  { %v36_v39 = vld [vmem:[%s946_s1] sm:$0xff]  ;;  %v109_v44 = vld [vmem:[#allocation3 + $0x208] sm:$0xff]  ;;  %v791_v46 = vpack.c.bf16 %v157_v37, %v156_v36  ;;  %v126_v48 = vld [vmem:[#allocation3 + $0x290] sm:$0xff]  ;;  %v176_v53 = vadd.f32 1e-06, %v38_v40 }
  0x2b   :  { %718 = vmatpush3.bf16.msra.mxu0 %v717_v10  ;;  %v108_v43 = vld [vmem:[#allocation3 + $0x200] sm:$0xff]  ;;  %v141_v47 = vld [vmem:[#allocation3 + $0x308] sm:$0xff]  ;;  %v127_v49 = vld [vmem:[#allocation3 + $0x298] sm:$0xff]  ;;  %v174_v50 = vadd.f32 1e-06, %v36_v39 }
  0x2c   :  { %750 = vmatpush3.bf16.msra.mxu1 %v749_v14  ;;  %720 = vmatprep.subr.bf16.mxu0 %v719_v15  ;;  %v140_v45 = vld [vmem:[#allocation3 + $0x300] sm:$0xff]  ;;  %v158_v51 = vld [vmem:[#allocation3 + $0x390] sm:$0xff]  ;;  %v159_v52 = vld [vmem:[#allocation3 + $0x398] sm:$0xff]  ;;  %v761_v54 = vpack.c.bf16 %v109_v44, %v108_v43  ;;  %v763_v56 = vpack.c.bf16 %v127_v49, %v126_v48  ;;  %v184_v11 = vmul.f32 %v176_v53, %v176_v53 }
  0x2d   :  { %752 = vmatprep.subr.bf16.mxu1 %v751_v19  ;;  %v793_v55 = vpack.c.bf16 %v141_v47, %v140_v45  ;;  %v110_v57 = vld [vmem:[#allocation3 + $0x210] sm:$0xff]  ;;  %v111_v58 = vld [vmem:[#allocation3 + $0x218] sm:$0xff]  ;;  %v182_v61 = vmul.f32 %v174_v50, %v174_v50  ;;  %v795_v62 = vpack.c.bf16 %v159_v52, %v158_v51  ;;  %v128_v0 = vld [vmem:[#allocation3 + $0x2a0] sm:$0xff] }
  0x2e   :  { %v142_v59 = vld [vmem:[#allocation3 + $0x310] sm:$0xff]  ;;  %v143_v63 = vld [vmem:[#allocation3 + $0x318] sm:$0xff]  ;;  %v129_v1 = vld [vmem:[#allocation3 + $0x2a8] sm:$0xff]  ;;  %v765_v4 = vpack.c.bf16 %v111_v58, %v110_v57 }
  0x2f   :  { %722 = vmatpush3.bf16.msra.mxu0 %v721_v26  ;;  %v160_v2 = vld [vmem:[#allocation3 + $0x3a0] sm:$0xff]  ;;  %v161_v3 = vld [vmem:[#allocation3 + $0x3a8] sm:$0xff]  ;;  %v797_v5 = vpack.c.bf16 %v143_v63, %v142_v59  ;;  %v767_v6 = vpack.c.bf16 %v129_v1, %v128_v0  ;;  %v190_v10 = vadd.f32 %v183_v60, %v182_v61  ;;  %v130_v14 = vld [vmem:[#allocation3 + $0x2b0] sm:$0xff] }
  0x30   :  { %754 = vmatpush3.bf16.msra.mxu1 %v753_v27  ;;  %724 = vmatprep.subr.bf16.mxu0 %v723_v28  ;;  %v112_v7 = vld [vmem:[#allocation3 + $0x220] sm:$0xff]  ;;  %v113_v8 = vld [vmem:[#allocation3 + $0x228] sm:$0xff]  ;;  %v799_v12 = vpack.c.bf16 %v161_v3, %v160_v2  ;;  %v131_v15 = vld [vmem:[#allocation3 + $0x2b8] sm:$0xff] }
  0x31   :  { %756 = vmatprep.subr.bf16.mxu1 %v755_v32  ;;  %v144_v9 = vld [vmem:[#allocation3 + $0x320] sm:$0xff]  ;;  %v145_v13 = vld [vmem:[#allocation3 + $0x328] sm:$0xff]  ;;  %v162_v16 = vld [vmem:[#allocation3 + $0x3b0] sm:$0xff]  ;;  %v769_v18 = vpack.c.bf16 %v113_v8, %v112_v7  ;;  %v771_v20 = vpack.c.bf16 %v131_v15, %v130_v14  ;;  %v191_v26 = vadd.f32 %v190_v10, %v184_v11 }
  0x32   :  { %v163_v17 = vld [vmem:[#allocation3 + $0x3b8] sm:$0xff]  ;;  %v801_v19 = vpack.c.bf16 %v145_v13, %v144_v9  ;;  %v114_v21 = vld [vmem:[#allocation3 + $0x230] sm:$0xff]  ;;  %v132_v29 = vld [vmem:[#allocation3 + $0x2c0] sm:$0xff] }
  0x33   :  { %726 = vmatpush3.bf16.msra.mxu0 %v725_v38  ;;  %v115_v22 = vld [vmem:[#allocation3 + $0x238] sm:$0xff]  ;;  %v146_v24 = vld [vmem:[#allocation3 + $0x330] sm:$0xff]  ;;  %v803_v27 = vpack.c.bf16 %v163_v17, %v162_v16  ;;  %v133_v30 = vld [vmem:[#allocation3 + $0x2c8] sm:$0xff]  ;;  %v192_v49 = vadd.f32 %v191_v26, %v185_v25 }
  0x34   :  { %758 = vmatpush3.bf16.msra.mxu1 %v757_v41  ;;  %760 = vmatprep.subr.bf16.mxu0 %v759_v42  ;;  %v147_v28 = vld [vmem:[#allocation3 + $0x338] sm:$0xff]  ;;  %v116_v31 = vld [vmem:[#allocation3 + $0x240] sm:$0xff]  ;;  %v117_v32 = vld [vmem:[#allocation3 + $0x248] sm:$0xff]  ;;  %v773_v35 = vpack.c.bf16 %v115_v22, %v114_v21  ;;  %v775_v39 = vpack.c.bf16 %v133_v30, %v132_v29 }
  0x35   :  { %792 = vmatprep.subr.bf16.mxu1 %v791_v46  ;;  %v164_v33 = vld [vmem:[#allocation3 + $0x3c0] sm:$0xff]  ;;  %v165_v34 = vld [vmem:[#allocation3 + $0x3c8] sm:$0xff]  ;;  %v805_v23 = vpack.c.bf16 %v147_v28, %v146_v24  ;;  %v43_v42 = vld [vmem:[%s946_s1 + $0x38] sm:$0xff]  ;;  %v777_v52 = vpack.c.bf16 %v117_v32, %v116_v31 }
  0x36   :  { %264 = vmatmul.mubr.f32.vlgmr.msra.gmra.mrb[0].mxu0 %v174_v50  ;;  %v148_v36 = vld [vmem:[#allocation3 + $0x340] sm:$0xff]  ;;  %v149_v37 = vld [vmem:[#allocation3 + $0x348] sm:$0xff]  ;;  %v42_v43 = vld [vmem:[%s946_s1 + $0x30] sm:$0xff]  ;;  %v807_v44 = vpack.c.bf16 %v165_v34, %v164_v33  ;;  %v181_v48 = vadd.f32 1e-06, %v43_v42 }
  0x37   :  { %334 = vmatmul.mubr.f32.vlgmr.msra.gmra.mrb[0].mxu1 %v176_v53  ;;  %762 = vmatpush3.bf16.msra.mxu0 %v761_v54  ;;  %v41_v38 = vld [vmem:[%s946_s1 + $0x28] sm:$0xff]  ;;  %v40_v41 = vld [vmem:[%s946_s1 + $0x20] sm:$0xff]  ;;  %v134_v45 = vld [vmem:[#allocation3 + $0x2d0] sm:$0xff]  ;;  %v180_v53 = vadd.f32 1e-06, %v42_v43 }
  0x38   :  { %794 = vmatpush3.bf16.msra.mxu1 %v793_v55  ;;  %764 = vmatprep.subr.bf16.mxu0 %v763_v56  ;;  %v179_v40 = vadd.f32 1e-06, %v41_v38  ;;  %v135_v46 = vld [vmem:[#allocation3 + $0x2d8] sm:$0xff]  ;;  %v928_v47 = vadd.f32 1e-06, %v40_v41  ;;  %v166_v50 = vld [vmem:[#allocation3 + $0x3d0] sm:$0xff]  ;;  %v809_v56 = vpack.c.bf16 %v149_v37, %v148_v36 }
  0x39   :  { %796 = vmatprep.subr.bf16.mxu1 %v795_v62  ;;  %v167_v51 = vld [vmem:[#allocation3 + $0x3d8] sm:$0xff]  ;;  %473 = vmatprep.mubr.f32.mxu1 %v181_v48  ;;  %v779_v57 = vpack.c.bf16 %v135_v46, %v134_v45  ;;  %v118_v58 = vld [vmem:[#allocation3 + $0x250] sm:$0xff]  ;;  %v136_v63 = vld [vmem:[#allocation3 + $0x2e0] sm:$0xff]  ;;  %v188_v1 = vmul.f32 %v180_v53, %v180_v53 }
  0x3a   :  { %403 = vmatprep.mubr.f32.mxu0 %v179_v40  ;;  %v186_v54 = vmul.f32 %v928_v47, %v928_v47  ;;  %v187_v55 = vmul.f32 %v179_v40, %v179_v40  ;;  %v119_v59 = vld [vmem:[#allocation3 + $0x258] sm:$0xff]  ;;  %v150_v60 = vld [vmem:[#allocation3 + $0x350] sm:$0xff]  ;;  %v811_v61 = vpack.c.bf16 %v167_v51, %v166_v50  ;;  %v137_v0 = vld [vmem:[#allocation3 + $0x2e8] sm:$0xff] }
  0x3b   :  { %766 = vmatpush3.bf16.msra.mxu0 %v765_v4  ;;  %v151_v62 = vld [vmem:[#allocation3 + $0x358] sm:$0xff]  ;;  %v168_v3 = vld [vmem:[#allocation3 + $0x3e0] sm:$0xff]  ;;  %v169_v4 = vld [vmem:[#allocation3 + $0x3e8] sm:$0xff]  ;;  %v783_v9 = vpack.c.bf16 %v137_v0, %v136_v63 }
  0x3c   :  { %798 = vmatpush3.bf16.msra.mxu1 %v797_v5  ;;  %768 = vmatprep.subr.bf16.mxu0 %v767_v6  ;;  %v193_v2 = vadd.f32 %v192_v49, %v186_v54  ;;  %v781_v5 = vpack.c.bf16 %v119_v59, %v118_v58  ;;  %v189_v6 = vmul.f32 %v181_v48, %v181_v48  ;;  %v120_v10 = vld [vmem:[#allocation3 + $0x260] sm:$0xff]  ;;  %v121_v11 = vld [vmem:[#allocation3 + $0x268] sm:$0xff]  ;;  %v138_v15 = vld [vmem:[#allocation3 + $0x2f0] sm:$0xff] }
  0x3d   :  { %800 = vmatprep.subr.bf16.mxu1 %v799_v12  ;;  %v813_v8 = vpack.c.bf16 %v151_v62, %v150_v60  ;;  %v152_v12 = vld [vmem:[#allocation3 + $0x360] sm:$0xff]  ;;  %v815_v13 = vpack.c.bf16 %v169_v4, %v168_v3  ;;  %v153_v14 = vld [vmem:[#allocation3 + $0x368] sm:$0xff]  ;;  %v139_v16 = vld [vmem:[#allocation3 + $0x2f8] sm:$0xff] }
  0x3e   :  { %v194_v7 = vadd.f32 %v193_v2, %v187_v55  ;;  %v817_v22 = vpack.c.bf16 %v153_v14, %v152_v12  ;;  %v787_v24 = vpack.c.bf16 %v139_v16, %v138_v15  ;;  %v122_v25 = vld [vmem:[#allocation3 + $0x270] sm:$0xff]  ;;  %v123_v26 = vld [vmem:[#allocation3 + $0x278] sm:$0xff]  ;;  %v173_v12 = vld [vmem:[%s949_s4] sm:$0x3] }
  0x3f   :  { %770 = vmatpush3.bf16.msra.mxu0 %v769_v18  ;;  %v170_v18 = vld [vmem:[#allocation3 + $0x3f0] sm:$0xff]  ;;  %v155_v29 = vld [vmem:[#allocation3 + $0x378] sm:$0xff]  ;;  %v789_v30 = vpack.c.bf16 %v123_v26, %v122_v25  ;;  %v537_v25 = vstv %s945_s0 }
  0x40   :  { %802 = vmatpush3.bf16.msra.mxu1 %v801_v19  ;;  %772 = vmatprep.subr.bf16.mxu0 %v771_v20  ;;  %v195_v17 = vadd.f32 %v194_v7, %v188_v1  ;;  %v171_v19 = vld [vmem:[#allocation3 + $0x3f8] sm:$0xff]  ;;  %v785_v20 = vpack.c.bf16 %v121_v11, %v120_v10  ;;  %v154_v28 = vld [vmem:[#allocation3 + $0x370] sm:$0xff] }
  0x41   :  { %804 = vmatprep.subr.bf16.mxu1 %v803_v27  ;;  %v819_v27 = vpack.c.bf16 %v171_v19, %v170_v18  ;;  %v821_v31 = vpack.c.bf16 %v155_v29, %v154_v28 }
  0x42   :  { %v196_v21 = vadd.f32 %v195_v17, %v189_v6 }
  0x43   :  { %774 = vmatpush3.bf16.msra.mxu0 %v773_v35 }
  0x44   :  { %806 = vmatpush3.bf16.msra.mxu1 %v805_v23  ;;  %776 = vmatprep.subr.bf16.mxu0 %v775_v39 }
  0x45   :  { %808 = vmatprep.subr.bf16.mxu1 %v807_v44  ;;  %197 = vadd.xlane.f32.xlu0 %v196_v21  ;;  %v554_v44 = vld [vmem:[%s948_s3] ss:$0 sm:$0xff] }
  0x47   :  { %778 = vmatpush3.bf16.msra.mxu0 %v777_v52 }
  0x48   :  { %810 = vmatpush3.bf16.msra.mxu1 %v809_v56  ;;  %780 = vmatprep.subr.bf16.mxu0 %v779_v57  ;;  %v496_v57 = vlaneseq }
  0x49   :  { %812 = vmatprep.subr.bf16.mxu1 %v811_v61 }
  0x4a   :  { %v497_v58 = vand.u32 127, %v496_v57  ;;  %v524_v7 = vshrl.u32 %v496_v57, 7 }
  0x4b   :  { %782 = vmatpush3.bf16.msra.mxu0 %v781_v5 }
  0x4c   :  { %814 = vmatpush3.bf16.msra.mxu1 %v813_v8  ;;  %784 = vmatprep.subr.bf16.mxu0 %v783_v9  ;;  %v525_v10 = vsub.s32 0, %v524_v7  ;;  %vm542_vm4 = vcmp.eq.s32.totalorder %v497_v58, 100  ;;  %vm544_vm5 = vcmp.eq.s32.totalorder %v497_v58, 101  ;;  %vm546_vm6 = vcmp.eq.s32.totalorder %v497_v58, 102 }
  0x4d   :  { %816 = vmatprep.subr.bf16.mxu1 %v815_v13  ;;  %v531_v13 = vsub.s32 1, %v524_v7 }
  0x4e   :  { %v526_v15 = vrot.slane %v173_v12, %v525_v10 }
  0x4f   :  { %786 = vmatpush3.bf16.msra.mxu0 %v785_v20  ;;  %v532_v17 = vrot.slane %v173_v12, %v531_v13 }
  0x50   :  { %818 = vmatpush3.bf16.msra.mxu1 %v817_v22  ;;  %788 = vmatprep.subr.bf16.mxu0 %v787_v24 }
  0x51   :  { %820 = vmatprep.subr.bf16.mxu1 %v819_v27 }
  0x53   :  { %790 = vmatpush3.bf16.msra.mxu0 %v789_v30 }
  0x54   :  { %822 = vmatpush3.bf16.msra.mxu1 %v821_v31 }
  0x56   :  { %404 = vmatmul.mubr.f32.vlgmr.msra.gmra.mrb[2].mxu0 %v928_v47 }
  0x57   :  { %474 = vmatmul.mubr.f32.vlgmr.msra.gmra.mrb[2].mxu1 %v180_v53 }
  0xd2   :  { %v198_v45 = vpop.xlane.xlu0 %197 }
  0xd3   :  { %v485_v48 = vadd.f32 %v554_v44, %v198_v45 }
 0x109   :  { %v587_v32 = vpop.f32.mrb[0].mxu0 }
 0x10a   :  { %v622_v33 = vpop.f32.mrb[0].mxu1  ;;  %v588_v34 = vpop.f32.mrb[1].mxu0 }
 0x10b   :  { %v589_v35 = vadd.f32 %v588_v34, %v587_v32  ;;  %v623_v36 = vpop.f32.mrb[1].mxu1 }
 0x10c   :  { %v624_v37 = vadd.f32 %v623_v36, %v622_v33 }
 0x10e   :  { %v336_v38 = vadd.f32 %v624_v37, %v589_v35 }
 0x129   :  { %v657_v23 = vpop.f32.mrb[2].mxu0 }
 0x12a   :  { %v658_v39 = vpop.f32.mrb[3].mxu0  ;;  %v692_v40 = vpop.f32.mrb[2].mxu1 }
 0x12b   :  { %v659_v41 = vadd.f32 %v658_v39, %v657_v23  ;;  %v693_v42 = vpop.f32.mrb[3].mxu1 }
 0x12c   :  { %v694_v43 = vadd.f32 %v693_v42, %v692_v40 }
 0x12d   :  { %v406_v46 = vadd.f32 %v659_v41, %v336_v38 }
 0x12f   :  { %v476_v47 = vadd.f32 %v694_v43, %v406_v46 }
 0x131   :  { %v486_v49 = vmul.f32 2.0, %v476_v47 }
 0x133   :  { %v487_v50 = vsub.f32 %v485_v48, %v486_v49 }
 0x135   :  { %v488_v51 = vmax.f32 %v487_v50, 0.0 }
 0x137   :  { %826 = vrsqrt.f32 %v488_v51  ;;  %vm491_vm0 = vcmp.eq.f32.partialorder %v488_v51, inf  ;;  %v494_v54 = vand.u32 2147483648, %v488_v51  ;;  %vm493_vm1 = vcmp.eq.f32.partialorder %v488_v51, 0.0 }
 0x141   :  { %v827_v52 = vpop.eup %826 }
 0x142   :  { %v490_v53 = vmul.f32 %v827_v52, %v488_v51 }
 0x144   :  { %v492_v55 = vsel %vm491_vm0, %v488_v51, %v490_v53 }
 0x145   :  { %v495_v56 = vsel %vm493_vm1, %v494_v54, %v492_v55 }
 0x146   :  { %498 = vmin.xlane.f32.xlu0 %v495_v56 }
 0x1d3   :  { %v499_v59 = vpop.xlane.xlu0 %498 }
 0x1d4   :  { %vm500_vm2 = vcmp.eq.f32.partialorder %v495_v56, %v499_v59  ;;  %v536_v27 = vsub.f32 %v499_v59, %v495_v56 }
 0x1d5   :  { %v501_v60 = vsel %vm500_vm2, %v497_v58, 128 }
 0x1d6   :  { %v503_v61 = vshra.s32 %v501_v60, 16  ;;  %v502_v63 = vand.u32 65535, %v501_v60 }
 0x1d8   :  { %v505_v62 = vcvt.s32.f32 %v503_v61  ;;  %v504_v1 = vcvt.s32.f32 %v502_v63 }
 0x1da   :  { %506 = vmin.xlane.f32.xlu1 %v505_v62 }
 0x267   :  { %v507_v0 = vpop.xlane.xlu1 %506 }
 0x268   :  { %vm508_vm3 = vcmp.eq.f32.partialorder %v505_v62, %v507_v0  ;;  %v513_v3 = vcvt.f32.s32 %v507_v0 }
 0x269   :  { %v509_v2 = vsel %vm508_vm3, %v504_v1, inf }
 0x26a   :  { %510 = vmin.xlane.f32.xlu1 %v509_v2  ;;  %v514_v5 = vshll.u32 %v513_v3, 16 }
 0x2f7   :  { %v511_v4 = vpop.xlane.xlu1 %510 }
 0x2f8   :  { %v512_v6 = vcvt.f32.s32 %v511_v4 }
 0x2fa   :  { %v515_v8 = vadd.s32 %v514_v5, %v512_v6 }
 0x2fc   :  { %v516_v9 = vcvt.s32.f32 %v515_v8 }
 0x2fe   :  { %v517_v11 = vadd.f32 0.5, %v516_v9 }
 0x300   :  { %v519_v14 = vmul.f32 0.1, %v517_v11 }
 0x302   :  { %v520_v16 = vfloor.f32 %v519_v14 }
 0x304   :  { %v521_v18 = vmul.f32 10.0, %v520_v16  ;;  %v527_v20 = vsub.f32 %v526_v15, %v520_v16 }
 0x306   :  { %v522_v19 = vsub.f32 %v516_v9, %v521_v18  ;;  %v528_v22 = vmul.f32 %v527_v20, %v527_v20 }
 0x308   :  { %v533_v21 = vsub.f32 %v532_v17, %v522_v19 }
 0x30a   :  { %v534_v24 = vmul.f32 %v533_v21, %v533_v21 }
 0x30c   :  { %v535_v26 = vadd.f32 %v534_v24, %v528_v22 }
 0x30e   :  { %v538_v28 = vmul.f32 %v537_v25, %v535_v26 }
 0x310   :  { %v539_v29 = vadd.f32 %v538_v28, %v536_v27 }
 0x312   :  { %v540_v30 = vmul.f32 1.442695, %v539_v29 }
 0x314   :  { %828 = vpow2.f32 %v540_v30 }
 0x31e   :  { %v829_v31 = vpop.eup %828 }
 0x31f   :  { %v543_v32 = vsel %vm542_vm4, %v520_v16, %v829_v31 }
 0x320   :  { %v545_v33 = vsel %vm544_vm5, %v522_v19, %v543_v32 }
 0x321   :  { %v547_v34 = vsel %vm546_vm6, %v499_v59, %v545_v33 }
 0x322   :  { %548 = vst [vmem:[%s950_s5] sm:$0xff] %v547_v34 }
 0x323   :  { %553 = vsyncpa [#allocation4], 1 }

</bundles_post_ra>
